<compile_context>
chip_gen: v6e
topology: v6e:2x2x1
jax: 0.10.0
libtpu: 0.0.40
codegen_flags: <defaults>
</compile_context>

<pallas_src>
import functools

import jax
import jax.numpy as jnp
from jax.experimental import pallas as pl
from jax.experimental.pallas import tpu as pltpu


_DEFAULT_TILE_ROWS = 2048      # rows (of 128 lanes) per grid step (~3 MiB useful for R=3)
_FAST_PATH_MAX_ELEMS = 16 * 1024   # below this, plain fused XLA beats a kernel launch


def _running_moments_kernel(scalars_ref, x_ref, state_ref, out_ref, acc_ref):
    """Grid over the folded reduce axis S (rows of 128 lanes).

    scalars_ref : SMEM (3,) int32 = [n_valid, s_valid_rows, new_count (=T)]
    x_ref       : VMEM (R, TS, 128) one folded, lane-dense tile of the slab
    state_ref   : VMEM (R, 4)  columns [sum, m2, count, std] (previous)
    out_ref     : VMEM (R, 4)  columns [sum, m2, count, std] (updated)
    acc_ref     : VMEM (R, 8)  Chan accumulators: col0=count, col1=sum, col2=M2
    """
    i = pl.program_id(0)
    last = pl.num_programs(0) - 1
    r, ts, lanes = x_ref.shape
    tile_elems = ts * lanes

    @pl.when(i == 0)
    def _init():
        acc_ref[...] = jnp.zeros_like(acc_ref)

    n_valid = scalars_ref[0]                     # valid elements per channel = T*B

    def _merge(cnt_t, sum_t, sumsq_t):
        # One-pass per-tile M2, then numerically stable Chan merge across tiles.
        safe = jnp.maximum(cnt_t, 1.0)
        mean_t = sum_t / safe
        m2_t = jnp.maximum(sumsq_t - cnt_t * mean_t * mean_t, 0.0)
        n_a = acc_ref[:, 0:1]
        s_a = acc_ref[:, 1:2]
        m_a = acc_ref[:, 2:3]
        mean_a = s_a / jnp.maximum(n_a, 1.0)
        n_new = n_a + cnt_t
        delta = mean_t - mean_a
        acc_ref[:, 0:1] = n_new
        acc_ref[:, 1:2] = s_a + sum_t
        acc_ref[:, 2:3] = (m_a + m2_t
                           + delta * delta * n_a * cnt_t / jnp.maximum(n_new, 1.0))

    def _tile_sums(x):
        s1 = jnp.sum(jnp.sum(x, axis=2), axis=1, keepdims=True)       # (r, 1)
        s2 = jnp.sum(jnp.sum(x * x, axis=2), axis=1, keepdims=True)   # (r, 1)
        return s1, s2

    # ---- full tiles: completely unmasked (all data real) -------------------
    @pl.when(i < last)
    def _full_tile():
        x = x_ref[...].astype(jnp.float32)
        s1, s2 = _tile_sums(x)
        _merge(float(tile_elems), s1, s2)

    # ---- tail tile: mask Pallas boundary rows; wrapper lane-pad is zeros ---
    @pl.when(i == last)
    def _tail_tile():
        x = x_ref[...].astype(jnp.float32)
        s_valid = scalars_ref[1]                 # valid rows = ceil(N / 128)
        row = jax.lax.broadcasted_iota(jnp.int32, (r, ts, lanes), 1) + i * ts
        x = jnp.where(row < s_valid, x, 0.0)
        cnt_t = jnp.maximum(n_valid - i * tile_elems, 0).astype(jnp.float32)
        s1, s2 = _tile_sums(x)
        _merge(cnt_t, s1, s2)

    # ---- finalize: fold into the running buffers, refresh std --------------
    @pl.when(i == last)
    def _finalize():
        new_count = scalars_ref[2].astype(jnp.float32)   # torch: len(reward_batch) = T
        n_f = acc_ref[:, 0:1]                            # = T*B
        s = acc_ref[:, 1:2]

        # torch uses new_mean = new_sum / T (NOT / (T*B)).  Shift the
        # accumulated M2 (about the true batch mean) to be about torch's
        # new_mean via: sum((x-c)^2) = sum((x-mean)^2) + N*(mean-c)^2.
        true_mean = s / jnp.maximum(n_f, 1.0)
        new_mean = s / new_count
        sq = acc_ref[:, 2:3] + n_f * (true_mean - new_mean) ** 2

        r_sum = state_ref[:, 0:1]
        r_m2 = state_ref[:, 1:2]
        r_cnt = state_ref[:, 2:3]

        curr_mean = r_sum / r_cnt
        new_m2 = sq + (r_cnt * new_count / (r_cnt + new_count)
                       * (new_mean - curr_mean) ** 2)

        upd_sum = r_sum + s
        upd_m2 = r_m2 + new_m2
        upd_cnt = r_cnt + new_count
        std = jnp.sqrt(upd_m2 / upd_cnt) + 1e-8

        # Single full-tile (R, 4) store instead of four masked column stores.
        col = jax.lax.broadcasted_iota(jnp.int32, (r, 4), 1)
        out_ref[...] = jnp.where(col == 0, upd_sum,
                        jnp.where(col == 1, upd_m2,
                         jnp.where(col == 2, upd_cnt, std)))


def _pallas_update(slab, n_valid, new_count, state, tile_rows):
    """Core Pallas path.  `slab` is channel-major, folded: (R, S, 128)."""
    R, S, L = slab.shape
    assert L == 128
    if S <= tile_rows:
        ts = S                                   # single full-extent tile
        num_tiles = 1
    else:
        if tile_rows % 8:
            raise ValueError("tile_rows must be a multiple of 8")
        ts = tile_rows
        num_tiles = -(-S // ts)                  # tail handled as boundary block

    scalars = jnp.array([n_valid, S, new_count], dtype=jnp.int32)

    grid_spec = pltpu.PrefetchScalarGridSpec(
        num_scalar_prefetch=1,
        grid=(num_tiles,),
        in_specs=[
            pl.BlockSpec((R, ts, L), lambda i, s: (0, i, 0)),   # folded reward slab
            pl.BlockSpec((R, 4), lambda i, s: (0, 0)),          # packed state (resident)
        ],
        out_specs=pl.BlockSpec((R, 4), lambda i, s: (0, 0)),
        scratch_shapes=[pltpu.VMEM((R, 8), jnp.float32)],       # merged accumulators
    )

    return pl.pallas_call(
        _running_moments_kernel,
        grid_spec=grid_spec,
        out_shape=jax.ShapeDtypeStruct((R, 4), jnp.float32),
        # inputs are (scalars, slab, state); alias the state buffer in place.
        input_output_aliases={2: 0},
        compiler_params=pltpu.CompilerParams(
            dimension_semantics=("arbitrary",),
            vmem_limit_bytes=32 * 1024 * 1024,
        ),
    )(scalars, slab, state)


def _update_jnp(reward_batch, state):
    """Small-N fast path: plain fused XLA (kernel launch overhead dominates)."""
    x = reward_batch.astype(jnp.float32)
    new_count = x.shape[0]
    batch_dim = tuple(range(x.ndim - 1))
    r_sum, r_m2, r_cnt = state[:, 0], state[:, 1], state[:, 2]
    new_sum = jnp.sum(x, batch_dim)
    new_mean = new_sum / new_count
    curr_mean = r_sum / r_cnt
    new_m2 = (jnp.sum((x - new_mean) ** 2, batch_dim)
              + r_cnt * new_count / (r_cnt + new_count) * (new_mean - curr_mean) ** 2)
    upd_cnt = r_cnt + new_count
    upd_sum = r_sum + new_sum
    upd_m2 = r_m2 + new_m2
    std = jnp.sqrt(upd_m2 / upd_cnt) + 1e-8
    return jnp.stack([upd_sum, upd_m2, upd_cnt, std], axis=1)


@functools.partial(jax.jit, static_argnames=("tile_rows", "use_pallas"))
def update_running_moments(reward_batch, state, *, tile_rows=_DEFAULT_TILE_ROWS,
                           use_pallas=None):
    """Fused update_running_moments + get_running_std.

    reward_batch : (..., R) with leading dim T (any float dtype; cast in-kernel)
    state        : (R, 4) float32, columns [reward_sum, reward_m2, reward_count, std]
    Returns the new (R, 4) state (std column refreshed).
    """
    R = reward_batch.shape[-1]
    new_count = reward_batch.shape[0]            # torch: len(reward_batch)
    n = 1
    for d in reward_batch.shape[:-1]:
        n *= d
    state = state.astype(jnp.float32)

    if use_pallas is None:
        use_pallas = (n * R) > _FAST_PATH_MAX_ELEMS
    if not use_pallas:
        return _update_jnp(reward_batch, state)

    # Channel-major, lane-dense, sublane-folded slab: (R, S, 128).
    # (Producers that can emit this layout directly should call _pallas_update
    #  and skip this relayout pass.)
    s_rows = -(-n // 128)
    x = reward_batch.reshape(n, R)
    pad = s_rows * 128 - n
    if pad:
        x = jnp.pad(x, ((0, pad), (0, 0)))       # zero lane-pad (fused with relayout)
    slab = jnp.transpose(x).reshape(R, s_rows, 128)
    return _pallas_update(slab, n, new_count, state, tile_rows)


def init_reward_state(num_rewards):
    """Packed (R, 4) state matching BaseNet.__init__ buffers (+ std column)."""
    z = jnp.zeros((num_rewards,), jnp.float32)
    cnt = jnp.full((num_rewards,), 1e-8, jnp.float32)
    return jnp.stack([z, z, cnt, z], axis=1)


def unpack_state(state):
    """Returns (reward_sum, reward_m2, reward_count, running_std), each (R,)."""
    return state[:, 0], state[:, 1], state[:, 2], state[:, 3]


def get_running_std(state):
    return state[:, 3]


def _reference(reward_batch, reward_sum, reward_m2, reward_count):
    """Plain-JAX reference mirroring the torch code."""
    batch_dim = tuple(range(reward_batch.ndim - 1))
    new_count = reward_batch.shape[0]
    new_sum = jnp.sum(reward_batch, batch_dim)
    new_mean = new_sum / new_count
    curr_mean = reward_sum / reward_count
    new_m2 = (jnp.sum((reward_batch - new_mean) ** 2, batch_dim)
              + reward_count * new_count / (reward_count + new_count)
              * (new_mean - curr_mean) ** 2)
    ncount = reward_count + new_count
    nsum = reward_sum + new_sum
    nm2 = reward_m2 + new_m2
    std = jnp.sqrt(nm2 / ncount) + 1e-8
    return nsum, nm2, ncount, std


def _check(got_tuple, want_tuple):
    for got, want in zip(got_tuple, want_tuple):
        assert jnp.allclose(got, want, rtol=1e-4, atol=1e-5), (got, want)


if __name__ == "__main__":
    # Synthetic "flags": multi_objective=True, num_objectives=2 -> num_rewards=3
    num_rewards = 3
    T, B = 8, 4

    key = jax.random.PRNGKey(0)
    k1, k2, k3 = jax.random.split(key, 3)

    state0 = init_reward_state(num_rewards)
    rs0, rm0, rc0, _ = unpack_state(state0)

    # --- update 1: small shape, force the Pallas path (single tile) ---------
    reward_batch = jax.random.normal(k1, (T, B, num_rewards), dtype=jnp.float32)
    ref1 = _reference(reward_batch, rs0, rm0, rc0)
    state1 = jax.block_until_ready(
        update_running_moments(reward_batch, state0, use_pallas=True))
    _check(unpack_state(state1), ref1)

    # --- update 2 chained on the updated buffers (running-mean semantics) ---
    reward_batch2 = 0.5 * jax.random.normal(k2, (T, B, num_rewards),
                                            dtype=jnp.float32) + 1.0
    ref2 = _reference(reward_batch2, ref1[0], ref1[1], ref1[2])
    state2 = jax.block_until_ready(
        update_running_moments(reward_batch2, state1, use_pallas=True))
    _check(unpack_state(state2), ref2)

    # --- multi-tile path: boundary block + tail masking + Chan merge --------
    T3, B3 = 32, 33                  # N = 1056 -> S = 9 rows -> 2 tiles of 8 rows
    reward_batch3 = jax.random.normal(k3, (T3, B3, num_rewards), dtype=jnp.float32)
    ref3 = _reference(reward_batch3, rs0, rm0, rc0)
    state3 = jax.block_until_ready(
        update_running_moments(reward_batch3, state0, use_pallas=True, tile_rows=8))
    _check(unpack_state(state3), ref3)

    # --- automatic small-N fast path (plain fused XLA) -----------------------
    state4 = jax.block_until_ready(update_running_moments(reward_batch, state0))
    _check(unpack_state(state4), ref1)

    print("KERNEL_OK")
</pallas_src>

<mosaic_0001>
module attributes {stable_mosaic.version = 11 : i64} {
  func.func @_running_moments_kernel(%arg0: i32, %arg1: memref<3xi32, #tpu.memory_space<smem>>, %arg2: memref<3x1x128xf32, #tpu.memory_space<vmem>>, %arg3: memref<3x4xf32, #tpu.memory_space<vmem>>, %arg4: memref<3x4xf32, #tpu.memory_space<vmem>>, %arg5: memref<3x8xf32, #tpu.memory_space<vmem>>) attributes {dimension_semantics = [#tpu.dimension_semantics<arbitrary>], iteration_bounds = array<i64: 1>, scalar_prefetch = 1 : i64, scratch_operands = 1 : i64, tpu.core_type = #tpu.core_type<tc>, window_params = [{transform_indices = @transform_0, window_bounds = array<i64: 3, 1, 128>}, {pipeline_mode = #tpu.pipeline_mode<synchronous>, transform_indices = @transform_1, window_bounds = array<i64: 3, 4>}, {pipeline_mode = #tpu.pipeline_mode<synchronous>, transform_indices = @transform_2, window_bounds = array<i64: 3, 4>}]} {
    %c0_i32 = arith.constant 0 : i32
    %0 = arith.cmpi eq, %arg0, %c0_i32 : i32
    %1 = arith.extui %0 : i1 to i32
    %c0_i32_0 = arith.constant 0 : i32
    %2 = arith.cmpi ne, %1, %c0_i32_0 : i32
    scf.if %2 {
      %cst = arith.constant 0.000000e+00 : f32
      %13 = vector.broadcast %cst : f32 to vector<3x8xf32>
      %c0_7 = arith.constant 0 : index
      %c0_8 = arith.constant 0 : index
      %14 = vector.load %arg5[%c0_7, %c0_8] : memref<3x8xf32, #tpu.memory_space<vmem>>, vector<3x8xf32>
      tpu.vector_store %arg5[%c0_7, %c0_8], %13 {strides = array<i32>} : memref<3x8xf32, #tpu.memory_space<vmem>>, vector<3x8xf32>,
    } else {
    }
    %c0 = arith.constant 0 : index
    %3 = memref.load %arg1[%c0] : memref<3xi32, #tpu.memory_space<smem>>
    %c0_i32_1 = arith.constant 0 : i32
    %4 = arith.cmpi slt, %arg0, %c0_i32_1 : i32
    %5 = arith.extui %4 : i1 to i32
    %c0_i32_2 = arith.constant 0 : i32
    %6 = arith.cmpi ne, %5, %c0_i32_2 : i32
    scf.if %6 {
      %c0_7 = arith.constant 0 : index
      %c0_8 = arith.constant 0 : index
      %c0_9 = arith.constant 0 : index
      %13 = vector.load %arg2[%c0_7, %c0_8, %c0_9] : memref<3x1x128xf32, #tpu.memory_space<vmem>>, vector<3x1x128xf32>
      %cst = arith.constant dense<0.000000e+00> : vector<3x1xf32>
      %14 = vector.multi_reduction <add>, %13, %cst [2] : vector<3x1x128xf32> to vector<3x1xf32>
      %cst_10 = arith.constant dense<0.000000e+00> : vector<3xf32>
      %15 = vector.multi_reduction <add>, %14, %cst_10 [1] : vector<3x1xf32> to vector<3xf32>
      %16 = vector.shape_cast %15 : vector<3xf32> to vector<3x1xf32>
      %17 = arith.mulf %13, %13 : vector<3x1x128xf32>
      %cst_11 = arith.constant dense<0.000000e+00> : vector<3x1xf32>
      %18 = vector.multi_reduction <add>, %17, %cst_11 [2] : vector<3x1x128xf32> to vector<3x1xf32>
      %cst_12 = arith.constant dense<0.000000e+00> : vector<3xf32>
      %19 = vector.multi_reduction <add>, %18, %cst_12 [1] : vector<3x1xf32> to vector<3xf32>
      %20 = vector.shape_cast %19 : vector<3xf32> to vector<3x1xf32>
      %cst_13 = arith.constant 1.280000e+02 : f32
      %cst_14 = arith.constant 1.000000e+00 : f32
      %21 = arith.maximumf %cst_13, %cst_14 : f32
      %22 = vector.broadcast %21 : f32 to vector<3x1xf32>
      %23 = arith.divf %16, %22 : vector<3x1xf32>
      %cst_15 = arith.constant 1.280000e+02 : f32
      %24 = vector.broadcast %cst_15 : f32 to vector<3x1xf32>
      %25 = arith.mulf %24, %23 : vector<3x1xf32>
      %26 = arith.mulf %25, %23 : vector<3x1xf32>
      %27 = arith.subf %20, %26 : vector<3x1xf32>
      %cst_16 = arith.constant 0.000000e+00 : f32
      %28 = vector.broadcast %cst_16 : f32 to vector<3x1xf32>
      %29 = arith.maximumf %27, %28 : vector<3x1xf32>
      %c0_17 = arith.constant 0 : index
      %c0_18 = arith.constant 0 : index
      %30 = vector.load %arg5[%c0_17, %c0_18] : memref<3x8xf32, #tpu.memory_space<vmem>>, vector<3x1xf32>
      %c0_19 = arith.constant 0 : index
      %c1 = arith.constant 1 : index
      %31 = vector.load %arg5[%c0_19, %c1] : memref<3x8xf32, #tpu.memory_space<vmem>>, vector<3x1xf32>
      %c0_20 = arith.constant 0 : index
      %c2 = arith.constant 2 : index
      %32 = vector.load %arg5[%c0_20, %c2] : memref<3x8xf32, #tpu.memory_space<vmem>>, vector<3x1xf32>
      %cst_21 = arith.constant 1.000000e+00 : f32
      %33 = vector.broadcast %cst_21 : f32 to vector<3x1xf32>
      %34 = arith.maximumf %30, %33 : vector<3x1xf32>
      %35 = arith.divf %31, %34 : vector<3x1xf32>
      %cst_22 = arith.constant 1.280000e+02 : f32
      %36 = vector.broadcast %cst_22 : f32 to vector<3x1xf32>
      %37 = arith.addf %30, %36 : vector<3x1xf32>
      %38 = arith.subf %23, %35 : vector<3x1xf32>
      %c0_23 = arith.constant 0 : index
      %c0_24 = arith.constant 0 : index
      %39 = vector.load %arg5[%c0_23, %c0_24] : memref<3x8xf32, #tpu.memory_space<vmem>>, vector<3x1xf32>
      tpu.vector_store %arg5[%c0_23, %c0_24], %37 {strides = array<i32>} : memref<3x8xf32, #tpu.memory_space<vmem>>, vector<3x1xf32>,
      %40 = arith.addf %31, %16 : vector<3x1xf32>
      %c0_25 = arith.constant 0 : index
      %c1_26 = arith.constant 1 : index
      %41 = vector.load %arg5[%c0_25, %c1_26] : memref<3x8xf32, #tpu.memory_space<vmem>>, vector<3x1xf32>
      tpu.vector_store %arg5[%c0_25, %c1_26], %40 {strides = array<i32>} : memref<3x8xf32, #tpu.memory_space<vmem>>, vector<3x1xf32>,
      %42 = arith.addf %32, %29 : vector<3x1xf32>
      %43 = arith.mulf %38, %38 : vector<3x1xf32>
      %44 = arith.mulf %43, %30 : vector<3x1xf32>
      %cst_27 = arith.constant 1.280000e+02 : f32
      %45 = vector.broadcast %cst_27 : f32 to vector<3x1xf32>
      %46 = arith.mulf %44, %45 : vector<3x1xf32>
      %cst_28 = arith.constant 1.000000e+00 : f32
      %47 = vector.broadcast %cst_28 : f32 to vector<3x1xf32>
      %48 = arith.maximumf %37, %47 : vector<3x1xf32>
      %49 = arith.divf %46, %48 : vector<3x1xf32>
      %50 = arith.addf %42, %49 : vector<3x1xf32>
      %c0_29 = arith.constant 0 : index
      %c2_30 = arith.constant 2 : index
      %51 = vector.load %arg5[%c0_29, %c2_30] : memref<3x8xf32, #tpu.memory_space<vmem>>, vector<3x1xf32>
      tpu.vector_store %arg5[%c0_29, %c2_30], %50 {strides = array<i32>} : memref<3x8xf32, #tpu.memory_space<vmem>>, vector<3x1xf32>,
    } else {
    }
    %c0_i32_3 = arith.constant 0 : i32
    %7 = arith.cmpi eq, %arg0, %c0_i32_3 : i32
    %8 = arith.extui %7 : i1 to i32
    %c0_i32_4 = arith.constant 0 : i32
    %9 = arith.cmpi ne, %8, %c0_i32_4 : i32
    scf.if %9 {
      %c0_7 = arith.constant 0 : index
      %c0_8 = arith.constant 0 : index
      %c0_9 = arith.constant 0 : index
      %13 = vector.load %arg2[%c0_7, %c0_8, %c0_9] : memref<3x1x128xf32, #tpu.memory_space<vmem>>, vector<3x1x128xf32>
      %c1 = arith.constant 1 : index
      %14 = memref.load %arg1[%c1] : memref<3xi32, #tpu.memory_space<smem>>
      %15 = tpu.iota {dimensions = array<i32: 1>} : vector<3x1x128xi32>
      %c1_i32 = arith.constant 1 : i32
      %16 = arith.muli %arg0, %c1_i32 : i32
      %17 = vector.broadcast %16 : i32 to vector<3x1x128xi32>
      %18 = arith.addi %15, %17 : vector<3x1x128xi32>
      %19 = vector.broadcast %14 : i32 to vector<3x1x128xi32>
      %20 = arith.cmpi slt, %18, %19 : vector<3x1x128xi32>
      %cst = arith.constant 0.000000e+00 : f32
      %21 = vector.broadcast %cst : f32 to vector<3x1x128xf32>
      %22 = arith.select %20, %13, %21 : vector<3x1x128xi1>, vector<3x1x128xf32>
      %c128_i32 = arith.constant 128 : i32
      %23 = arith.muli %arg0, %c128_i32 : i32
      %24 = arith.subi %3, %23 : i32
      %c0_i32_10 = arith.constant 0 : i32
      %25 = arith.maxsi %24, %c0_i32_10 : i32
      %26 = arith.sitofp %25 : i32 to f32
      %cst_11 = arith.constant dense<0.000000e+00> : vector<3x1xf32>
      %27 = vector.multi_reduction <add>, %22, %cst_11 [2] : vector<3x1x128xf32> to vector<3x1xf32>
      %cst_12 = arith.constant dense<0.000000e+00> : vector<3xf32>
      %28 = vector.multi_reduction <add>, %27, %cst_12 [1] : vector<3x1xf32> to vector<3xf32>
      %29 = vector.shape_cast %28 : vector<3xf32> to vector<3x1xf32>
      %30 = arith.mulf %22, %22 : vector<3x1x128xf32>
      %cst_13 = arith.constant dense<0.000000e+00> : vector<3x1xf32>
      %31 = vector.multi_reduction <add>, %30, %cst_13 [2] : vector<3x1x128xf32> to vector<3x1xf32>
      %cst_14 = arith.constant dense<0.000000e+00> : vector<3xf32>
      %32 = vector.multi_reduction <add>, %31, %cst_14 [1] : vector<3x1xf32> to vector<3xf32>
      %33 = vector.shape_cast %32 : vector<3xf32> to vector<3x1xf32>
      %cst_15 = arith.constant 1.000000e+00 : f32
      %34 = arith.maximumf %26, %cst_15 : f32
      %35 = vector.broadcast %34 : f32 to vector<3x1xf32>
      %36 = arith.divf %29, %35 : vector<3x1xf32>
      %37 = vector.broadcast %26 : f32 to vector<3x1xf32>
      %38 = arith.mulf %37, %36 : vector<3x1xf32>
      %39 = arith.mulf %38, %36 : vector<3x1xf32>
      %40 = arith.subf %33, %39 : vector<3x1xf32>
      %cst_16 = arith.constant 0.000000e+00 : f32
      %41 = vector.broadcast %cst_16 : f32 to vector<3x1xf32>
      %42 = arith.maximumf %40, %41 : vector<3x1xf32>
      %c0_17 = arith.constant 0 : index
      %c0_18 = arith.constant 0 : index
      %43 = vector.load %arg5[%c0_17, %c0_18] : memref<3x8xf32, #tpu.memory_space<vmem>>, vector<3x1xf32>
      %c0_19 = arith.constant 0 : index
      %c1_20 = arith.constant 1 : index
      %44 = vector.load %arg5[%c0_19, %c1_20] : memref<3x8xf32, #tpu.memory_space<vmem>>, vector<3x1xf32>
      %c0_21 = arith.constant 0 : index
      %c2 = arith.constant 2 : index
      %45 = vector.load %arg5[%c0_21, %c2] : memref<3x8xf32, #tpu.memory_space<vmem>>, vector<3x1xf32>
      %cst_22 = arith.constant 1.000000e+00 : f32
      %46 = vector.broadcast %cst_22 : f32 to vector<3x1xf32>
      %47 = arith.maximumf %43, %46 : vector<3x1xf32>
      %48 = arith.divf %44, %47 : vector<3x1xf32>
      %49 = vector.broadcast %26 : f32 to vector<3x1xf32>
      %50 = arith.addf %43, %49 : vector<3x1xf32>
      %51 = arith.subf %36, %48 : vector<3x1xf32>
      %c0_23 = arith.constant 0 : index
      %c0_24 = arith.constant 0 : index
      %52 = vector.load %arg5[%c0_23, %c0_24] : memref<3x8xf32, #tpu.memory_space<vmem>>, vector<3x1xf32>
      tpu.vector_store %arg5[%c0_23, %c0_24], %50 {strides = array<i32>} : memref<3x8xf32, #tpu.memory_space<vmem>>, vector<3x1xf32>,
      %53 = arith.addf %44, %29 : vector<3x1xf32>
      %c0_25 = arith.constant 0 : index
      %c1_26 = arith.constant 1 : index
      %54 = vector.load %arg5[%c0_25, %c1_26] : memref<3x8xf32, #tpu.memory_space<vmem>>, vector<3x1xf32>
      tpu.vector_store %arg5[%c0_25, %c1_26], %53 {strides = array<i32>} : memref<3x8xf32, #tpu.memory_space<vmem>>, vector<3x1xf32>,
      %55 = arith.addf %45, %42 : vector<3x1xf32>
      %56 = arith.mulf %51, %51 : vector<3x1xf32>
      %57 = arith.mulf %56, %43 : vector<3x1xf32>
      %58 = vector.broadcast %26 : f32 to vector<3x1xf32>
      %59 = arith.mulf %57, %58 : vector<3x1xf32>
      %cst_27 = arith.constant 1.000000e+00 : f32
      %60 = vector.broadcast %cst_27 : f32 to vector<3x1xf32>
      %61 = arith.maximumf %50, %60 : vector<3x1xf32>
      %62 = arith.divf %59, %61 : vector<3x1xf32>
      %63 = arith.addf %55, %62 : vector<3x1xf32>
      %c0_28 = arith.constant 0 : index
      %c2_29 = arith.constant 2 : index
      %64 = vector.load %arg5[%c0_28, %c2_29] : memref<3x8xf32, #tpu.memory_space<vmem>>, vector<3x1xf32>
      tpu.vector_store %arg5[%c0_28, %c2_29], %63 {strides = array<i32>} : memref<3x8xf32, #tpu.memory_space<vmem>>, vector<3x1xf32>,
    } else {
    }
    %c0_i32_5 = arith.constant 0 : i32
    %10 = arith.cmpi eq, %arg0, %c0_i32_5 : i32
    %11 = arith.extui %10 : i1 to i32
    %c0_i32_6 = arith.constant 0 : i32
    %12 = arith.cmpi ne, %11, %c0_i32_6 : i32
    scf.if %12 {
      %c2 = arith.constant 2 : index
      %13 = memref.load %arg1[%c2] : memref<3xi32, #tpu.memory_space<smem>>
      %14 = arith.sitofp %13 : i32 to f32
      %c0_7 = arith.constant 0 : index
      %c0_8 = arith.constant 0 : index
      %15 = vector.load %arg5[%c0_7, %c0_8] : memref<3x8xf32, #tpu.memory_space<vmem>>, vector<3x1xf32>
      %c0_9 = arith.constant 0 : index
      %c1 = arith.constant 1 : index
      %16 = vector.load %arg5[%c0_9, %c1] : memref<3x8xf32, #tpu.memory_space<vmem>>, vector<3x1xf32>
      %cst = arith.constant 1.000000e+00 : f32
      %17 = vector.broadcast %cst : f32 to vector<3x1xf32>
      %18 = arith.maximumf %15, %17 : vector<3x1xf32>
      %19 = arith.divf %16, %18 : vector<3x1xf32>
      %20 = vector.broadcast %14 : f32 to vector<3x1xf32>
      %21 = arith.divf %16, %20 : vector<3x1xf32>
      %c0_10 = arith.constant 0 : index
      %c2_11 = arith.constant 2 : index
      %22 = vector.load %arg5[%c0_10, %c2_11] : memref<3x8xf32, #tpu.memory_space<vmem>>, vector<3x1xf32>
      %23 = arith.subf %19, %21 : vector<3x1xf32>
      %24 = arith.mulf %23, %23 : vector<3x1xf32>
      %25 = arith.mulf %15, %24 : vector<3x1xf32>
      %26 = arith.addf %22, %25 : vector<3x1xf32>
      %c0_12 = arith.constant 0 : index
      %c0_13 = arith.constant 0 : index
      %27 = vector.load %arg3[%c0_12, %c0_13] : memref<3x4xf32, #tpu.memory_space<vmem>>, vector<3x1xf32>
      %c0_14 = arith.constant 0 : index
      %c1_15 = arith.constant 1 : index
      %28 = vector.load %arg3[%c0_14, %c1_15] : memref<3x4xf32, #tpu.memory_space<vmem>>, vector<3x1xf32>
      %c0_16 = arith.constant 0 : index
      %c2_17 = arith.constant 2 : index
      %29 = vector.load %arg3[%c0_16, %c2_17] : memref<3x4xf32, #tpu.memory_space<vmem>>, vector<3x1xf32>
      %30 = arith.divf %27, %29 : vector<3x1xf32>
      %31 = vector.broadcast %14 : f32 to vector<3x1xf32>
      %32 = arith.mulf %29, %31 : vector<3x1xf32>
      %33 = vector.broadcast %14 : f32 to vector<3x1xf32>
      %34 = arith.addf %29, %33 : vector<3x1xf32>
      %35 = arith.divf %32, %34 : vector<3x1xf32>
      %36 = arith.subf %21, %30 : vector<3x1xf32>
      %37 = arith.mulf %36, %36 : vector<3x1xf32>
      %38 = arith.mulf %35, %37 : vector<3x1xf32>
      %39 = arith.addf %26, %38 : vector<3x1xf32>
      %40 = arith.addf %27, %16 : vector<3x1xf32>
      %41 = arith.addf %28, %39 : vector<3x1xf32>
      %42 = vector.broadcast %14 : f32 to vector<3x1xf32>
      %43 = arith.addf %29, %42 : vector<3x1xf32>
      %44 = arith.divf %41, %43 : vector<3x1xf32>
      %45 = math.sqrt %44 : vector<3x1xf32>
      %cst_18 = arith.constant 9.99999993E-9 : f32
      %46 = vector.broadcast %cst_18 : f32 to vector<3x1xf32>
      %47 = arith.addf %45, %46 : vector<3x1xf32>
      %48 = tpu.iota {dimensions = array<i32: 1>} : vector<3x4xi32>
      %c0_i32_19 = arith.constant 0 : i32
      %49 = vector.broadcast %c0_i32_19 : i32 to vector<3x4xi32>
      %50 = arith.cmpi eq, %48, %49 : vector<3x4xi32>
      %c1_i32 = arith.constant 1 : i32
      %51 = vector.broadcast %c1_i32 : i32 to vector<3x4xi32>
      %52 = arith.cmpi eq, %48, %51 : vector<3x4xi32>
      %c2_i32 = arith.constant 2 : i32
      %53 = vector.broadcast %c2_i32 : i32 to vector<3x4xi32>
      %54 = arith.cmpi eq, %48, %53 : vector<3x4xi32>
      %55 = vector.shape_cast %43 : vector<3x1xf32> to vector<3x1xf32>
      %56 = vector.broadcast %55 : vector<3x1xf32> to vector<3x4xf32>
      %57 = vector.shape_cast %47 : vector<3x1xf32> to vector<3x1xf32>
      %58 = vector.broadcast %57 : vector<3x1xf32> to vector<3x4xf32>
      %59 = arith.select %54, %56, %58 : vector<3x4xi1>, vector<3x4xf32>
      %60 = vector.shape_cast %41 : vector<3x1xf32> to vector<3x1xf32>
      %61 = vector.broadcast %60 : vector<3x1xf32> to vector<3x4xf32>
      %62 = arith.select %52, %61, %59 : vector<3x4xi1>, vector<3x4xf32>
      %63 = vector.shape_cast %40 : vector<3x1xf32> to vector<3x1xf32>
      %64 = vector.broadcast %63 : vector<3x1xf32> to vector<3x4xf32>
      %65 = arith.select %50, %64, %62 : vector<3x4xi1>, vector<3x4xf32>
      %c0_20 = arith.constant 0 : index
      %c0_21 = arith.constant 0 : index
      %66 = vector.load %arg4[%c0_20, %c0_21] : memref<3x4xf32, #tpu.memory_space<vmem>>, vector<3x4xf32>
      tpu.vector_store %arg4[%c0_20, %c0_21], %65 {strides = array<i32>} : memref<3x4xf32, #tpu.memory_space<vmem>>, vector<3x4xf32>,
    } else {
    }
    return
  }
  func.func @transform_0(%arg0: i32, %arg1: memref<3xi32, #tpu.memory_space<smem>>) -> (i32, i32, i32) {
    %c0_i32 = arith.constant 0 : i32
    %c0_i32_0 = arith.constant 0 : i32
    %c0_i32_1 = arith.constant 0 : i32
    return %c0_i32, %arg0, %c0_i32_0 : i32, i32, i32
  }
  func.func @transform_1(%arg0: i32, %arg1: memref<3xi32, #tpu.memory_space<smem>>) -> (i32, i32) {
    %c0_i32 = arith.constant 0 : i32
    %c0_i32_0 = arith.constant 0 : i32
    %c0_i32_1 = arith.constant 0 : i32
    return %c0_i32, %c0_i32_0 : i32, i32
  }
  func.func @transform_2(%arg0: i32, %arg1: memref<3xi32, #tpu.memory_space<smem>>) -> (i32, i32) {
    %c0_i32 = arith.constant 0 : i32
    %c0_i32_0 = arith.constant 0 : i32
    %c0_i32_1 = arith.constant 0 : i32
    return %c0_i32, %c0_i32_0 : i32, i32
  }
}

</mosaic_0001>

<bundles_post_ra>
// kernel: update_running_moments.1
= control target key start
LH: loop header
LB: loop body
LE: loop exit
PB: predicated region body
PF: predicated region fallthrough
CT: control target
= control target key end

     0   :  { %s646_s0 = inlined_call_operand.vmem [shape: s32[3], index: 0, kind: input, shape index: {}]   ;;  %s647_s1 = inlined_call_operand.vmem [shape: f32[3,1,128], index: 1, kind: input, shape index: {}]   ;;  %s648_s2 = inlined_call_operand.hbm [shape: f32[3,4], index: 2, kind: input, shape index: {}, may-alias: {2,3}]   ;;  %s649_s3 = inlined_call_operand.hbm [shape: f32[3,4], index: 3, kind: output, shape index: {}, may-alias: {2,3}]  }
   0x1   :  { %s8_s14 = sshll.u32 %s646_s0, 4  ;;  %s9_s14 = int_to_ptr.vmem [resolvable:$true] %s8_s14 }
   0x2   :  { %s492_s15 = scalar_lea.vmem %s9_s14, 16  ;;  %p497_p1 = scmp.lt.s32.totalorder %s9_s14, %s9_s14 }
   0x3   :  { %p493_p0 = scmp.ne.s32.totalorder %s9_s14, %s492_s15  ;;  %p498_p2 = scmp.lt.s32.totalorder %s492_s15, %s492_s15 }
   0x5   :  { %p499_p3 = por %p498_p2, %p497_p1 }
   0x7   :  { %p500_p4 = pnand %p499_p3, %p493_p0 }
   0x9   :  { %503 = shalt.err (!%p500_p4)  }
   0xa   :  { %s550_s16 = smov [#allocation4]  }
   0xb   :  { %11 = dma.vmem_to_smem %s9_s14, 16, %s550_s16, [#allocation3] }
   0xc   :  { %544 = dma.done.wait [#allocation3], 16 }
   0xd   :  { %545 = vsyncadd [#allocation3], 4294967280 }
   0xe   :  { %13 = sfence }
   0xf   :  { %14 = vsyncpa [#allocation6], 0 }
  0x10   :  { %15 = vsyncpa [#allocation7], 0  ;;  %s551_s17 = smov [#allocation5]  }
  0x11   :  { %s24_s18 = sshll.u32 %s551_s17, 4  ;;  %s25_s18 = int_to_ptr.vmem [resolvable:$true] %s24_s18 }
  0x12   :  { %s512_s19 = scalar_lea.vmem %s25_s18, 64  ;;  %p517_p6 = scmp.lt.s32.totalorder %s25_s18, %s25_s18 }
  0x13   :  { %p513_p5 = scmp.ne.s32.totalorder %s25_s18, %s512_s19  ;;  %p518_p7 = scmp.lt.s32.totalorder %s512_s19, %s512_s19 }
  0x15   :  { %p519_p8 = por %p518_p7, %p517_p6 }
  0x17   :  { %p520_p9 = pnand %p519_p8, %p513_p5 }
  0x19   :  { %523 = shalt.err (!%p520_p9)
}
  0x1a   :  { %27 = dma.hbm_to_vmem [thread:$0]  %s648_s2, 64, %s25_s18, [#allocation6]  }
  0x1b   :  { %546 = dma.done.wait [#allocation6], 64  }
  0x1c   :  { %547 = vsyncadd [#allocation6], 4294967232  ;;  %vm35_vm0 = vcmask 59392   ;;  %v185_v0 = vlaneseq  ;;  %v552_v1 = vmov 0.0   ;;  %s451_s21 = sld [smem:[#allocation4 + $0x1]]  ;;  %vm199_vm1 = vcmask 1040384  }
  0x1d   :  { %36 = vst.msk [vmem:[#allocation2] sm:$0x7] %vm35_vm0, %v552_v1  ;;  %v183_v3 = vld [vmem:[%s647_s1 + $0x2] sm:$0x1]  ;;  %v181_v5 = vld [vmem:[%s647_s1] sm:$0x1] }
  0x1e   :  { %v186_v2 = vshrl.u32 %v185_v0, 7  ;;  %s553_s2 = smov 1   ;;  %v182_v12 = vld [vmem:[%s647_s1 + $0x1] sm:$0x1]  ;;  %s37_s28 = sld [smem:[#allocation4]]  ;;  %vm270_vm3 = vcmask 2048  }
  0x1f   :  { %s554_s1 = smov 1.0   ;;  %s555_s4 = smov 127   ;;  %vm276_vm4 = vcmask 1041409   ;;  %vm279_vm5 = vcmask 1042434   ;;  %vm283_vm6 = vcmask 10248   ;;  %vm333_vm7 = vcmask 18448  }
  0x20   :  { %s556_s5 = smov 2   ;;  %s557_s6 = smov 126   ;;  %vm434_vm13 = vcmask 26624  }
  0x21   :  { %s452_s7 = sld [smem:[#allocation4 + $0x2]]  ;;  %s561_s9 = smov [#allocation8]  }
  0x22   :  { %v189_v4 = vstv %s451_s21  ;;  %s442_s10 = sshll.u32 %s561_s9, 4  ;;  %s443_s10 = int_to_ptr.vmem [resolvable:$true] %s442_s10 }
  0x23   :  { %vm190_vm2 = vcmp.lt.s32.totalorder %v186_v2, %v189_v4  ;;  %s524_s11 = scalar_lea.vmem %s443_s10, 64  ;;  %p529_p12 = scmp.lt.s32.totalorder %s443_s10, %s443_s10 }
  0x24   :  { %v595_v6 = vld [vmem:[#allocation2] sm:$0x7]  ;;  %v193_v8 = vsel %vm190_vm2, %v183_v3, 0.0  ;;  %v191_v9 = vsel %vm190_vm2, %v181_v5, 0.0  ;;  %v192_v13 = vsel %vm190_vm2, %v182_v12, 0.0  ;;  %p196_p10 = scmp.gt.s32.totalorder %s37_s28, 0  ;;  %p525_p11 = scmp.ne.s32.totalorder %s443_s10, %s524_s11 }
  0x25   :  { %v247_v7 = vmax.f32 %v595_v6, 1.0  ;;  %v206_v10 = vsel %vm199_vm1, %v193_v8, 0.0  ;;  %v200_v11 = vsel %vm199_vm1, %v191_v9, 0.0  ;;  %v213_v14 = vmul.f32 %v192_v13, %v192_v13  ;;  %p530_p13 = scmp.lt.s32.totalorder %s524_s11, %s524_s11 }
  0x26   :  { %207 = vadd.xlane.f32.xlu1 %v206_v10  ;;  %v214_v16 = vmul.f32 %v193_v8, %v193_v8  ;;  %v203_v17 = vsel %vm199_vm1, %v192_v13, 0.0  ;;  %v212_v19 = vmul.f32 %v191_v9, %v191_v9  ;;  %s651_s28 = smov (!%p196_p10, %s37_s28), 0  ;;  %v298_v44 = vrot.slane %v595_v6, 1 }
  0x27   :  { %249 = vrot.lane.b32.xlu0 %v247_v7, %s553_s2  ;;  %v218_v15 = vsel %vm199_vm1, %v213_v14, 0.0  ;;  %s198_s29 = scvt.s32.f32 %s651_s28  ;;  %v299_v49 = vrot.slane %v595_v6, 2  ;;  %s336_s8 = scvt.s32.f32 %s452_s7 }
  0x28   :  { %v221_v18 = vsel %vm199_vm1, %v214_v16, 0.0  ;;  %v215_v20 = vsel %vm199_vm1, %v212_v19, 0.0  ;;  %p531_p0 = por %p530_p13, %p529_p12 }
  0x29   :  { %v608_v21 = vstv %s198_s29  ;;  %s227_s30 = smax.f32 %s554_s1, %s198_s29 }
  0x2a   :  { %201 = vadd.xlane.f32.xlu1 %v200_v11  ;;  %v254_v23 = vadd.f32 %v595_v6, %v608_v21  ;;  %v228_v24 = vstv %s227_s30  ;;  %p532_p1 = pnand %p531_p0, %p525_p11 }
  0x2c   :  { %271 = vst.msk [vmem:[#allocation2] sm:$0x7] %vm270_vm3, %v254_v23  ;;  %v309_v40 = vmax.f32 %v254_v23, 1.0 }
  0x2e   :  { %v311_v41 = vrot.slane %v309_v40, 1  ;;  %v312_v42 = vrot.slane %v309_v40, 2 }
  0x46   :  { %204 = vadd.xlane.f32.xlu0 %v203_v17 }
  0x4a   :  { %222 = vadd.xlane.f32.xlu0 %v221_v18 }
  0x4e   :  { %216 = vadd.xlane.f32.xlu0 %v215_v20 }
  0x99   :  { %v250_v22 = vpop.permute.xlu0 %249 }
  0x9a   :  { %470 = vrcp.f32 %v250_v22 }
  0x9b   :  { %472 = vrcp.f32 %v228_v24 }
  0x9c   :  { %474 = vrcp.f32 %v311_v41 }
  0x9d   :  { %476 = vrcp.f32 %v312_v42 }
  0x9e   :  { %478 = vrcp.f32 %v309_v40 }
  0xa7   :  { %v471_v25 = vpop.eup %470 }
  0xa8   :  { %v253_v26 = vmul.f32 %v471_v25, %v595_v6  ;;  %v473_v28 = vpop.eup %472 }
  0xa9   :  { %v475_v57 = vpop.eup %474 }
  0xaa   :  { %v256_v27 = vrot.slane %v253_v26, 1  ;;  %v257_v29 = vrot.slane %v253_v26, 2  ;;  %v477_v58 = vpop.eup %476 }
  0xab   :  { %v479_v63 = vpop.eup %478 }
  0xac   :  { %260 = vrot.lane.b32.xlu1 %v256_v27, %s555_s4 }
  0xaf   :  { %v208_v30 = vpop.xlane.xlu1 %207 }
  0xb0   :  { %262 = vrot.lane.b32.xlu1 %v257_v29, %s555_s4  ;;  %v232_v31 = vmul.f32 %v473_v28, %v208_v30  ;;  %v278_v32 = vrot.slane %v208_v30, 6 }
  0xb2   :  { %v236_v10 = vmul.f32 %v608_v21, %v232_v31 }
  0xb3   :  { %v202_v34 = vpop.xlane.xlu1 %201 }
  0xb4   :  { %258 = vrot.lane.b32.xlu1 %v253_v26, %s555_s4  ;;  %v230_v51 = vmul.f32 %v473_v28, %v202_v34  ;;  %v239_v16 = vmul.f32 %v236_v10, %v232_v31 }
  0xb6   :  { %v234_v13 = vmul.f32 %v608_v21, %v230_v51 }
  0xb8   :  { %v237_v17 = vmul.f32 %v234_v13, %v230_v51  ;;  %v408_v13 = vand.u32 127, %v185_v0 }
  0xba   :  { %vm411_vm10 = vcmp.eq.s32.totalorder %v408_v13, 2  ;;  %vm410_vm11 = vcmp.eq.s32.totalorder %v408_v13, 1  ;;  %vm409_vm12 = vcmp.eq.s32.totalorder %v408_v13, 0 }
  0xcf   :  { %v205_v33 = vpop.xlane.xlu0 %204 }
  0xd0   :  { %v231_v35 = vmul.f32 %v473_v28, %v205_v33  ;;  %v275_v36 = vrot.slane %v205_v33, 7  ;;  %v360_v33 = vld [vmem:[#allocation5] sm:$0x7] }
  0xd2   :  { %v277_v37 = vsel %vm276_vm4, %v275_v36, %v202_v34  ;;  %v235_v9 = vmul.f32 %v608_v21, %v231_v35  ;;  %v345_v34 = vstv %s336_s8 }
  0xd3   :  { %v280_v38 = vsel %vm279_vm5, %v278_v32, %v277_v37  ;;  %v223_v11 = vpop.xlane.xlu0 %222  ;;  %480 = vrcp.f32 %v345_v34 }
  0xd4   :  { %v282_v39 = vadd.f32 %v280_v38, %v595_v6  ;;  %v238_v14 = vmul.f32 %v235_v9, %v231_v35  ;;  %v242_v20 = vsub.f32 %v223_v11, %v239_v16 }
  0xd6   :  { %284 = vst.msk [vmem:[#allocation2] sm:$0x7] %vm283_vm6, %v282_v39  ;;  %v245_v24 = vmax.f32 %v242_v20, 0.0 }
  0xd7   :  { %v217_v18 = vpop.xlane.xlu0 %216 }
  0xd8   :  { %219 = vadd.xlane.f32.xlu1 %v218_v15  ;;  %v240_v22 = vsub.f32 %v217_v18, %v237_v17  ;;  %v290_v27 = vrot.slane %v245_v24, 6 }
  0xda   :  { %v243_v25 = vmax.f32 %v240_v22, 0.0 }
 0x11e   :  { %v261_v43 = vpop.permute.xlu1 %260 }
 0x11f   :  { %v268_v45 = vsub.f32 %v231_v35, %v261_v43 }
 0x121   :  { %v295_v46 = vmul.f32 %v268_v45, %v268_v45 }
 0x122   :  { %v263_v47 = vpop.permute.xlu1 %262 }
 0x123   :  { %v304_v48 = vmul.f32 %v298_v44, %v295_v46  ;;  %v269_v50 = vsub.f32 %v232_v31, %v263_v47 }
 0x125   :  { %v296_v52 = vmul.f32 %v269_v50, %v269_v50  ;;  %v307_v54 = vmul.f32 %v304_v48, %v608_v21  ;;  %v558_v48 = vmov 2   ;;  %v368_v50 = vadd.f32 %v360_v33, %v345_v34 }
 0x126   :  { %v259_v53 = vpop.permute.xlu1 %258  ;;  %465 = vset.pattern.permute.xlu1 %v558_v48 }
 0x127   :  { %v305_v55 = vmul.f32 %v299_v49, %v296_v52  ;;  %v267_v56 = vsub.f32 %v230_v51, %v259_v53  ;;  %v319_v61 = vmul.f32 %v475_v57, %v307_v54  ;;  %v367_v51 = vmul.f32 %v360_v33, %v345_v34 }
 0x128   :  { %v559_v52 = vmov 1  }
 0x129   :  { %v308_v59 = vmul.f32 %v305_v55, %v608_v21  ;;  %v294_v60 = vmul.f32 %v267_v56, %v267_v56  ;;  %v325_v3 = vrot.slane %v319_v61, 7  ;;  %466 = vset.pattern.permute.xlu0 %v559_v52 }
 0x12b   :  { %v303_v62 = vmul.f32 %v294_v60, %v595_v6  ;;  %v321_v1 = vmul.f32 %v477_v58, %v308_v59 }
 0x12d   :  { %v306_v2 = vmul.f32 %v303_v62, %v608_v21  ;;  %v327_v5 = vrot.slane %v321_v1, 6 }
 0x12f   :  { %v317_v4 = vmul.f32 %v479_v63, %v306_v2 }
 0x131   :  { %v326_v7 = vsel %vm276_vm4, %v325_v3, %v317_v4  ;;  %v560_v4 = vmov 0  }
 0x132   :  { %v328_v8 = vsel %vm279_vm5, %v327_v5, %v326_v7 }
 0x133   :  { %329 = vrot.lane.b32.xlu0 %v328_v8, %s556_s5 }
 0x161   :  { %v220_v12 = vpop.xlane.xlu1 %219 }
 0x162   :  { %v241_v15 = vsub.f32 %v220_v12, %v238_v14 }
 0x164   :  { %v244_v19 = vmax.f32 %v241_v15, 0.0 }
 0x166   :  { %v288_v23 = vrot.slane %v244_v19, 7 }
 0x168   :  { %v289_v26 = vsel %vm276_vm4, %v288_v23, %v243_v25 }
 0x169   :  { %v291_v28 = vsel %vm279_vm5, %v290_v27, %v289_v26 }
 0x16a   :  { %v293_v29 = vadd.f32 %v291_v28, %v595_v6  ;;  %v481_v6 = vpop.eup %480 }
 0x1a5   :  { %v330_v21 = vpop.permute.xlu0 %329 }
 0x1a6   :  { %v332_v30 = vadd.f32 %v330_v21, %v293_v29 }
 0x1a8   :  { %334 = vst.msk [vmem:[#allocation2] sm:$0x7] %vm333_vm7, %v332_v30 }
 0x1af   :  { %v337_v31 = vld [vmem:[#allocation2] sm:$0x7] }
 0x1b0   :  { %v338_v32 = vmax.f32 %v337_v31, 1.0  ;;  %v347_v39 = vmul.f32 %v481_v6, %v337_v31 }
 0x1b2   :  { %340 = vrot.lane.b32.xlu0 %v338_v32, %s553_s2 }
 0x1b6   :  { %362 = vrot.lane.b32.xlu0 %v360_v33, %s557_s6 }
 0x224   :  { %v341_v35 = vpop.permute.xlu0 %340 }
 0x225   :  { %482 = vrcp.f32 %v341_v35 }
 0x228   :  { %v363_v36 = vpop.permute.xlu0 %362 }
 0x229   :  { %484 = vrcp.f32 %v363_v36 }
 0x22a   :  { %486 = vrcp.f32 %v368_v50 }
 0x232   :  { %v483_v37 = vpop.eup %482 }
 0x233   :  { %v344_v38 = vmul.f32 %v483_v37, %v337_v31 }
 0x235   :  { %v348_v40 = vsub.f32 %v344_v38, %v347_v39 }
 0x236   :  { %v485_v41 = vpop.eup %484 }
 0x237   :  { %v349_v42 = vmul.f32 %v348_v40, %v348_v40  ;;  %v366_v43 = vmul.f32 %v485_v41, %v360_v33  ;;  %v487_v53 = vpop.eup %486 }
 0x238   :  { %v370_v55 = vmul.f32 %v487_v53, %v367_v51 }
 0x239   :  { %351 = vrot.lane.b32.xlu0 %v349_v42, %s555_s4  ;;  %372 = vrot.lane.b32.xlu1 %v366_v43, %s553_s2 }
 0x2ab   :  { %v373_v44 = vpop.permute.xlu1 %372  ;;  %v352_v45 = vpop.permute.xlu0 %351 }
 0x2ac   :  { %v375_v46 = vsub.f32 %v347_v39, %v373_v44  ;;  %v354_v47 = vmul.f32 %v352_v45, %v337_v31 }
 0x2ae   :  { %356 = vrot.lane.b32.xlu0 %v354_v47, %s556_s5  ;;  %v376_v49 = vmul.f32 %v375_v46, %v375_v46 }
 0x2b2   :  { %378 = vrot.lane.b32.xlu0 %v376_v49, %s553_s2 }
 0x2b6   :  { %394 = vrot.lane.b32.xlu0 %v368_v50, %s555_s4 }
 0x2ba   :  { %384 = vrot.lane.b32.xlu0 %v337_v31, %s555_s4 }
 0x320   :  { %v357_v54 = vpop.permute.xlu0 %356 }
 0x321   :  { %v359_v57 = vadd.f32 %v357_v54, %v337_v31 }
 0x324   :  { %v379_v56 = vpop.permute.xlu0 %378 }
 0x325   :  { %v381_v58 = vmul.f32 %v379_v56, %v370_v55 }
 0x327   :  { %v382_v59 = vadd.f32 %v381_v58, %v359_v57 }
 0x328   :  { %v395_v60 = vpop.permute.xlu0 %394 }
 0x329   :  { %389 = vrot.lane.b32.xlu1 %v382_v59, %s555_s4  ;;  %488 = vrcp.f32 %v395_v60 }
 0x32c   :  { %v385_v1 = vpop.permute.xlu0 %384 }
 0x32d   :  { %413 = vperm.xlu1 %465, %v368_v50   ;;  %v387_v3 = vadd.f32 %v385_v1, %v360_v33 }
 0x331   :  { %467 = vset.pattern.permute.xlu1 %v559_v52 }
 0x336   :  { %v489_v61 = vpop.eup %488 }
 0x39b   :  { %v390_v62 = vpop.permute.xlu1 %389 }
 0x39c   :  { %v392_v63 = vadd.f32 %v390_v62, %v360_v33 }
 0x39e   :  { %v398_v2 = vmul.f32 %v489_v61, %v392_v63  ;;  %424 = vperm.xlu1 %467, %v392_v63  }
 0x3a0   :  { %490 = vrsqrt.f32 %v398_v2  ;;  %vm401_vm8 = vcmp.eq.f32.partialorder %v398_v2, inf  ;;  %v404_v8 = vand.u32 2147483648, %v398_v2  ;;  %vm403_vm9 = vcmp.eq.f32.partialorder %v398_v2, 0.0 }
 0x3a2   :  { %468 = vset.pattern.permute.xlu1 %v560_v4 }
 0x3a3   :  { %430 = vperm.xlu1 %468, %v387_v3  }
 0x3a8   :  { %v414_v12 = vpop.permute.xlu1 %413 }
 0x3ad   :  { %v491_v5 = vpop.eup %490 }
 0x3ae   :  { %v400_v7 = vmul.f32 %v491_v5, %v398_v2 }
 0x3b0   :  { %v402_v9 = vsel %vm401_vm8, %v398_v2, %v400_v7 }
 0x3b1   :  { %v405_v10 = vsel %vm403_vm9, %v404_v8, %v402_v9 }
 0x3b2   :  { %v406_v11 = vadd.f32 1e-08, %v405_v10 }
 0x3b4   :  { %418 = vperm.xlu0 %466, %v406_v11  }
 0x3b8   :  { %469 = vset.pattern.permute.xlu0 %v560_v4 }
 0x419   :  { %v425_v14 = vpop.permute.xlu1 %424 }
 0x41e   :  { %v431_v17 = vpop.permute.xlu1 %430 }
 0x42f   :  { %v419_v15 = vpop.permute.xlu0 %418 }
 0x430   :  { %v421_v16 = vsel %vm411_vm10, %v414_v12, %v419_v15 }
 0x431   :  { %v427_v18 = vsel %vm410_vm11, %v425_v14, %v421_v16 }
 0x432   :  { %v433_v19 = vsel %vm409_vm12, %v431_v17, %v427_v18 }
 0x433   :  { %435 = vst.msk [vmem:[#allocation8] sm:$0x7] %vm434_vm13, %v433_v19 }
 0x434   :  { %535 = shalt.err (!%p532_p1)
}
 0x435   :  { %445 = dma.vmem_to_hbm [thread:$0]  %s443_s10, 64, %s649_s3, [#allocation7]  }
 0x436   :  { %548 = dma.done.wait [#allocation7], 64  }
 0x437   :  { %549 = vsyncadd [#allocation7], 4294967232 }
 0x438   :  { %449 = vsyncpa [#allocation6], 1 }
 0x439   :  { %450 = vsyncpa [#allocation7], 1 }

</bundles_post_ra>
